<compile_context>
chip_gen: v7x
topology: tpu7x:2x2x1
jax: 0.10.0
libtpu: 0.0.40
codegen_flags: <defaults>
</compile_context>

<pallas_src>
import jax
import jax.numpy as jnp
from jax.experimental import pallas as pl
from jax.experimental.pallas import tpu as pltpu

IN_F = 330           # Linear in_features
OUT_F = 62           # Linear out_features

NO_GRID_MAX_B = 1024   # up to this batch: single no-grid call (everything in VMEM)
TILE_B_MAX = 2048      # max rows per grid step for the B-tiled path


def linear_kernel(x_ref, w_ref, b_ref, o_ref):
    # x_ref: (tb, 330) f32, w_ref: (330, 62) f32, b_ref: (1, 62) f32.
    # f32 MXU matmul with f32 accumulation; f32 epilogue (no bf16 VPU work on v5e).
    acc = jnp.dot(x_ref[...], w_ref[...], preferred_element_type=jnp.float32)
    o_ref[...] = (acc + b_ref[...]).astype(o_ref.dtype)


def prepare_params(w, b):
    """One-time parameter prep (hoisted out of the forward).

    torch layout w: (62, 330), b: (62,)  ->  w_t: (330, 62) f32, b_row: (1, 62) f32.
    """
    w_t = jnp.asarray(w, jnp.float32).T
    b_row = jnp.asarray(b, jnp.float32).reshape(1, OUT_F)
    return w_t, b_row


def dummy_model_forward(x, w_t, b_row):
    """x: (B, 330) -> (B, 62) f32.  Equivalent to torch.nn.Linear(330, 62)(x)."""
    B = x.shape[0]
    x = x.astype(jnp.float32)

    if B <= NO_GRID_MAX_B:
        # Small batch: no grid, no pipeline -- whole arrays live in VMEM.
        return pl.pallas_call(
            linear_kernel,
            out_shape=jax.ShapeDtypeStruct((B, OUT_F), jnp.float32),
            in_specs=[
                pl.BlockSpec(memory_space=pltpu.MemorySpace.VMEM),
                pl.BlockSpec(memory_space=pltpu.MemorySpace.VMEM),
                pl.BlockSpec(memory_space=pltpu.MemorySpace.VMEM),
            ],
            out_specs=pl.BlockSpec(memory_space=pltpu.MemorySpace.VMEM),
        )(x, w_t, b_row)

    # Large batch: stream x / out through a B-tiled pipeline, weight + bias stay
    # VMEM-resident (index_map -> (0, 0)).  Tile chosen so the grid has >= 2
    # steps (keeps both v7x TensorCores busy) with 1-2K rows per step
    # (~5-7 MiB double-buffered VMEM -- far under the 32 MiB scoped default).
    tile_b = min(TILE_B_MAX, ((pl.cdiv(B, 2) + 7) // 8) * 8)
    grid_len = pl.cdiv(B, tile_b)   # partial last block handled by Pallas (masked stores)

    return pl.pallas_call(
        linear_kernel,
        out_shape=jax.ShapeDtypeStruct((B, OUT_F), jnp.float32),
        grid=(grid_len,),
        in_specs=[
            # Raw f32 x, batch-tiled; last dim 330 == full array dim (legal, no K pad).
            pl.BlockSpec((tile_b, IN_F), lambda i: (i, 0)),
            # Weight / bias: full blocks, reused across every grid step.
            pl.BlockSpec((IN_F, OUT_F), lambda i: (0, 0)),
            pl.BlockSpec((1, OUT_F), lambda i: (0, 0)),
        ],
        # Real (B, 62) output (62 == full dim): no padded slab + slice pass.
        out_specs=pl.BlockSpec((tile_b, OUT_F), lambda i: (i, 0)),
        compiler_params=pltpu.CompilerParams(
            dimension_semantics=("parallel",)),
    )(x, w_t, b_row)


if __name__ == "__main__":
    key = jax.random.PRNGKey(0)
    k_x, k_w, k_b, k_x2 = jax.random.split(key, 4)

    # Deterministic parameter init (mimics torch.nn.Linear's uniform fan-in init).
    bound = 1.0 / (IN_F ** 0.5)
    w = jax.random.uniform(k_w, (OUT_F, IN_F), jnp.float32, -bound, bound)  # (out, in)
    b = jax.random.uniform(k_b, (OUT_F,), jnp.float32, -bound, bound)

    # One-time prep, outside the forward (hoisted per review).
    w_t, b_row = prepare_params(w, b)

    def ref(xv):
        return xv @ w.T + b.reshape(1, OUT_F)

    # --- small batch -> no-grid path ---
    B = 8
    x = jax.random.normal(k_x, (B, IN_F), jnp.float32)
    y = dummy_model_forward(x, w_t, b_row)
    jax.block_until_ready(y)
    assert y.shape == (B, OUT_F)
    assert jnp.allclose(y, ref(x), atol=2e-2, rtol=2e-2)

    # --- larger batch -> 2-step B-tiled ("parallel") grid path ---
    B_big = 2048
    x_big = jax.random.normal(k_x2, (B_big, IN_F), jnp.float32)
    y_big = dummy_model_forward(x_big, w_t, b_row)
    jax.block_until_ready(y_big)
    assert y_big.shape == (B_big, OUT_F)
    assert jnp.allclose(y_big, ref(x_big), atol=2e-2, rtol=2e-2)

    print("KERNEL_OK")
</pallas_src>

<mosaic_0001>
module attributes {stable_mosaic.version = 11 : i64} {
  func.func @linear_kernel(%arg0: memref<8x330xf32, #tpu.memory_space<vmem>>, %arg1: memref<330x62xf32, #tpu.memory_space<vmem>>, %arg2: memref<1x62xf32, #tpu.memory_space<vmem>>, %arg3: memref<8x62xf32, #tpu.memory_space<vmem>>) attributes {dimension_semantics = [], scalar_prefetch = 0 : i64, scratch_operands = 0 : i64, tpu.core_type = #tpu.core_type<tc>} {
    %c0 = arith.constant 0 : index
    %c0_0 = arith.constant 0 : index
    %0 = vector.load %arg0[%c0, %c0_0] : memref<8x330xf32, #tpu.memory_space<vmem>>, vector<8x330xf32>
    %c0_1 = arith.constant 0 : index
    %c0_2 = arith.constant 0 : index
    %1 = vector.load %arg1[%c0_1, %c0_2] : memref<330x62xf32, #tpu.memory_space<vmem>>, vector<330x62xf32>
    %cst = arith.constant dense<0.000000e+00> : vector<8x62xf32>
    %2 = tpu.matmul %0, %1, %cst {dimension_numbers = #tpu.dot_dimension_numbers<[1], [0], [0], [1], [0, 0, 1, 1], [], []>} : vector<8x330xf32>, vector<330x62xf32>, vector<8x62xf32> -> vector<8x62xf32>
    %c0_3 = arith.constant 0 : index
    %c0_4 = arith.constant 0 : index
    %3 = vector.load %arg2[%c0_3, %c0_4] : memref<1x62xf32, #tpu.memory_space<vmem>>, vector<1x62xf32>
    %4 = vector.broadcast %3 : vector<1x62xf32> to vector<8x62xf32>
    %5 = arith.addf %2, %4 : vector<8x62xf32>
    %c0_5 = arith.constant 0 : index
    %c0_6 = arith.constant 0 : index
    %6 = vector.load %arg3[%c0_5, %c0_6] : memref<8x62xf32, #tpu.memory_space<vmem>>, vector<8x62xf32>
    tpu.vector_store %arg3[%c0_5, %c0_6], %5 {strides = array<i32>} : memref<8x62xf32, #tpu.memory_space<vmem>>, vector<8x62xf32>,
    return
  }
}

</mosaic_0001>

<bundles_post_ra>
// kernel: tpu_custom_call.1
= control target key start
LH: loop header
LB: loop body
LE: loop exit
PB: predicated region body
PF: predicated region fallthrough
CT: control target
= control target key end

     0   :  { %v380_v7 = vmov 0.0|0.0   ;;  %vm381_vm0 = vmmov 0   ;;  %v382_v13 = vmov 0.0   ;;  %s560_s0 = inlined_call_operand.vmem [shape: f32[8,330], index: 0, kind: input, shape index: {}]   ;;  %s561_s1 = inlined_call_operand.vmem [shape: f32[330,62], index: 1, kind: input, shape index: {}]   ;;  %s562_s2 = inlined_call_operand.vmem [shape: f32[1,62], index: 2, kind: input, shape index: {}]   ;;  %s563_s3 = inlined_call_operand.hbm [shape: f32[8,62], index: 3, kind: output, shape index: {}]  }
   0x1   :  { %v34_v0 = vld [vmem:[%s561_s1 + $0x80] sm:$0xff]  ;;  %v35_v1 = vld [vmem:[%s561_s1 + $0x88] sm:$0xff]  ;;  %v36_v5 = vld [vmem:[%s561_s1 + $0x90] sm:$0xff]  ;;  %335 = vmatprep.subr.bf16.mxu1 %v380_v7  ;;  %300 = vmatprep.mubr.msk.f32.mxu1 %vm381_vm0, %v382_v13 }
   0x2   :  { %v18_v2 = vld [vmem:[%s561_s1] sm:$0xff]  ;;  %v303_v3 = vpack.c.bf16 %v35_v1, %v34_v0  ;;  %v19_v4 = vld [vmem:[%s561_s1 + $0x8] sm:$0xff]  ;;  %v37_v6 = vld [vmem:[%s561_s1 + $0x98] sm:$0xff] }
   0x3   :  { %v305_v8 = vpack.c.bf16 %v19_v4, %v18_v2  ;;  %v307_v9 = vpack.c.bf16 %v37_v6, %v36_v5  ;;  %v20_v10 = vld [vmem:[%s561_s1 + $0x10] sm:$0xff]  ;;  %v21_v11 = vld [vmem:[%s561_s1 + $0x18] sm:$0xff]  ;;  %v38_v12 = vld [vmem:[%s561_s1 + $0xa0] sm:$0xff] }
   0x4   :  { %304 = vmatprep.subr.bf16.mxu0 %v303_v3  ;;  %v39_v14 = vld [vmem:[%s561_s1 + $0xa8] sm:$0xff]  ;;  %v309_v15 = vpack.c.bf16 %v21_v11, %v20_v10  ;;  %v22_v17 = vld [vmem:[%s561_s1 + $0x20] sm:$0xff]  ;;  %v40_v19 = vld [vmem:[%s561_s1 + $0xb0] sm:$0xff] }
   0x5   :  { %306 = vmatpush3.bf16.msra.mxu0 %v305_v8  ;;  %v311_v16 = vpack.c.bf16 %v39_v14, %v38_v12  ;;  %v23_v18 = vld [vmem:[%s561_s1 + $0x28] sm:$0xff]  ;;  %v41_v20 = vld [vmem:[%s561_s1 + $0xb8] sm:$0xff]  ;;  %v50_v21 = vld [vmem:[%s561_s1 + $0x100] sm:$0xff] }
   0x6   :  { %308 = vmatprep.subr.bf16.mxu0 %v307_v9  ;;  %v51_v22 = vld [vmem:[%s561_s1 + $0x108] sm:$0xff]  ;;  %v313_v23 = vpack.c.bf16 %v23_v18, %v22_v17  ;;  %v52_v25 = vld [vmem:[%s561_s1 + $0x110] sm:$0xff]  ;;  %v315_v26 = vpack.c.bf16 %v41_v20, %v40_v19  ;;  %v25_v28 = vld [vmem:[%s561_s1 + $0x38] sm:$0xff] }
   0x7   :  { %v336_v24 = vpack.c.bf16 %v51_v22, %v50_v21  ;;  %v24_v27 = vld [vmem:[%s561_s1 + $0x30] sm:$0xff]  ;;  %v53_v29 = vld [vmem:[%s561_s1 + $0x118] sm:$0xff]  ;;  %v42_v30 = vld [vmem:[%s561_s1 + $0xc0] sm:$0xff] }
   0x8   :  { %v43_v31 = vld [vmem:[%s561_s1 + $0xc8] sm:$0xff]  ;;  %v339_v32 = vpack.c.bf16 %v53_v29, %v52_v25  ;;  %v54_v33 = vld [vmem:[%s561_s1 + $0x120] sm:$0xff]  ;;  %v317_v35 = vpack.c.bf16 %v25_v28, %v24_v27  ;;  %v44_v40 = vld [vmem:[%s561_s1 + $0xd0] sm:$0xff] }
   0x9   :  { %310 = vmatpush3.bf16.msra.mxu0 %v309_v15  ;;  %337 = vmatpush3.bf16.msra.mxu1 %v336_v24  ;;  %v55_v34 = vld [vmem:[%s561_s1 + $0x128] sm:$0xff]  ;;  %v319_v36 = vpack.c.bf16 %v43_v31, %v42_v30  ;;  %v26_v37 = vld [vmem:[%s561_s1 + $0x40] sm:$0xff]  ;;  %v45_v41 = vld [vmem:[%s561_s1 + $0xd8] sm:$0xff] }
   0xa   :  { %312 = vmatprep.subr.bf16.mxu0 %v311_v16  ;;  %338 = vmatprep.subr.bf16.mxu1 %v380_v7  ;;  %v27_v38 = vld [vmem:[%s561_s1 + $0x48] sm:$0xff]  ;;  %v342_v42 = vpack.c.bf16 %v55_v34, %v54_v33  ;;  %v56_v43 = vld [vmem:[%s561_s1 + $0x130] sm:$0xff]  ;;  %v57_v44 = vld [vmem:[%s561_s1 + $0x138] sm:$0xff] }
   0xb   :  { %v16_v39 = vld [vmem:[%s560_s0 + $0x8] sm:$0xff] }
   0xc   :  { %139 = vmatprep.mubr.f32.mxu0 %v16_v39 }
   0xd   :  { %314 = vmatpush3.bf16.msra.mxu0 %v313_v23  ;;  %340 = vmatpush3.bf16.msra.mxu1 %v339_v32 }
   0xe   :  { %316 = vmatprep.subr.bf16.mxu0 %v315_v26  ;;  %341 = vmatprep.subr.bf16.mxu1 %v380_v7 }
   0xf   :  { %8 = vsyncpa [#allocation3], 0  ;;  %v321_v45 = vpack.c.bf16 %v27_v38, %v26_v37  ;;  %v323_v46 = vpack.c.bf16 %v45_v41, %v44_v40  ;;  %v28_v47 = vld [vmem:[%s561_s1 + $0x50] sm:$0xff]  ;;  %v29_v48 = vld [vmem:[%s561_s1 + $0x58] sm:$0xff]  ;;  %v345_v51 = vpack.c.bf16 %v57_v44, %v56_v43  ;;  %vm71_vm1 = vcmask 1041408   ;;  %s384_s22 = smov [#allocation2]  }
  0x10   :  { %v46_v49 = vld [vmem:[%s561_s1 + $0xe0] sm:$0xff]  ;;  %v47_v50 = vld [vmem:[%s561_s1 + $0xe8] sm:$0xff]  ;;  %v325_v54 = vpack.c.bf16 %v29_v48, %v28_v47  ;;  %v48_v58 = vld [vmem:[%s561_s1 + $0xf0] sm:$0xff]  ;;  %vm383_vm2 = vmmov 1   ;;  %vm67_vm4 = vcmask 605184   ;;  %s223_s23 = sshll.u32 %s384_s22, 4  ;;  %s224_s23 = int_to_ptr.vmem [resolvable:$true] %s223_s23 }
  0x11   :  { %318 = vmatpush3.bf16.msra.mxu0 %v317_v35  ;;  %343 = vmatpush3.bf16.msra.mxu1 %v342_v42  ;;  %v58_v52 = vld [vmem:[%s561_s1 + $0x140] sm:$0xff]  ;;  %v59_v53 = vld [vmem:[%s561_s1 + $0x148] sm:$0x3]  ;;  %v327_v55 = vpack.c.bf16 %v47_v50, %v46_v49  ;;  %v49_v59 = vld [vmem:[%s561_s1 + $0xf8] sm:$0xff]  ;;  %vm215_vm5 = vcmask 506880   ;;  %s356_s24 = scalar_lea.vmem %s224_s23, 128  ;;  %p361_p1 = scmp.lt.s32.totalorder %s224_s23, %s224_s23 }
  0x12   :  { %320 = vmatprep.subr.bf16.mxu0 %v319_v36  ;;  %344 = vmatprep.subr.bf16.mxu1 %v380_v7  ;;  %v30_v56 = vld [vmem:[%s561_s1 + $0x60] sm:$0xff]  ;;  %v31_v57 = vld [vmem:[%s561_s1 + $0x68] sm:$0xff]  ;;  %v348_v60 = vpack.c.bf16 %v59_v53, %v58_v52  ;;  %vm349_vm3 = vmpackc.low %vm71_vm1, %vm383_vm2  ;;  %v331_v62 = vpack.c.bf16 %v49_v59, %v48_v58  ;;  %p357_p0 = scmp.ne.s32.totalorder %s224_s23, %s356_s24  ;;  %p362_p2 = scmp.lt.s32.totalorder %s356_s24, %s356_s24 }
  0x13   :  { %v329_v61 = vpack.c.bf16 %v31_v57, %v30_v56  ;;  %v32_v63 = vld [vmem:[%s561_s1 + $0x70] sm:$0xff]  ;;  %v33_v0 = vld [vmem:[%s561_s1 + $0x78] sm:$0xff]  ;;  %v15_v3 = vld [vmem:[%s560_s0] sm:$0xff] }
  0x14   :  { %v17_v1 = vld [vmem:[%s560_s0 + $0x10] sm:$0xff]  ;;  %v333_v2 = vpack.c.bf16 %v33_v0, %v32_v63  ;;  %v231_v8 = vld [vmem:[%s562_s2] ss:$0 sm:$0xff]  ;;  %p363_p3 = por %p362_p2, %p361_p1 }
  0x15   :  { %322 = vmatpush3.bf16.msra.mxu0 %v321_v45  ;;  %346 = vmatpush3.bf16.msra.mxu1 %v345_v51 }
  0x16   :  { %324 = vmatprep.subr.bf16.mxu0 %v323_v46  ;;  %347 = vmatprep.subr.bf16.mxu1 %v380_v7  ;;  %p364_p4 = pnand %p363_p3, %p357_p0 }
  0x19   :  { %326 = vmatpush3.bf16.msra.mxu0 %v325_v54  ;;  %350 = vmatpush3.bf16.msk.msra.mxu1 %vm349_vm3, %v348_v60 }
  0x1a   :  { %328 = vmatprep.subr.bf16.mxu0 %v327_v55 }
  0x1c   :  { %301 = vmatmul.mubr.msk.f32.vlgmr.msra.gmra.mrb[0].mxu1 %vm67_vm4, %v17_v1 }
  0x1d   :  { %330 = vmatpush3.bf16.msra.mxu0 %v329_v61 }
  0x1e   :  { %332 = vmatprep.subr.bf16.mxu0 %v331_v62 }
  0x21   :  { %334 = vmatpush3.bf16.msra.mxu0 %v333_v2 }
  0x24   :  { %140 = vmatmul.mubr.f32.vlgmr.msra.gmra.mrb[0].mxu0 %v15_v3 }
  0xef   :  { %v211_v4 = vpop.f32.mrb[0].mxu1 }
  0xf0   :  { %v302_v5 = vpop.f32.mrb[1].mxu1 }
  0xf7   :  { %v266_v6 = vpop.f32.mrb[0].mxu0 }
  0xf8   :  { %v267_v7 = vpop.f32.mrb[1].mxu0 }
  0xf9   :  { %v268_v9 = vadd.f32 %v267_v7, %v266_v6 }
  0xfb   :  { %v142_v10 = vadd.f32 %v268_v9, %v231_v8 }
  0xfd   :  { %v212_v11 = vadd.f32 %v211_v4, %v142_v10 }
  0xff   :  { %216 = vst.msk [vmem:[#allocation2] sm:$0xff] %vm215_vm5, %v212_v11 }
 0x100   :  { %367 = shalt.err (!%p364_p4)
}
 0x101   :  { %s368_s26 = scalar_lea.hbm %s563_s3, 128 }
 0x102   :  { %p369_p5 = scmp.ne.s32.totalorder %s563_s3, %s368_s26  ;;  %p372_p6 = scmp.lt.u32.totalorder %s368_s26, %s563_s3 }
 0x104   :  { %p374_p7 = pnand %p372_p6, %p369_p5 }
 0x106   :  { %377 = shalt.err (!%p374_p7)
}
 0x107   :  { %226 = dma.vmem_to_hbm [thread:$0]  %s224_s23, 128, %s563_s3, [#allocation3]  }
 0x108   :  { %378 = dma.done.wait [#allocation3], 128  }
 0x109   :  { %379 = vsyncadd [#allocation3], 4294967168 }
 0x10a   :  { %230 = vsyncpa [#allocation3], 1 }

</bundles_post_ra>
